<compile_context>
chip_gen: v7x
topology: tpu7x:2x2x1
jax: 0.10.0
libtpu: 0.0.40
codegen_flags: <defaults>
</compile_context>

<pallas_src>
import functools

import jax
import jax.numpy as jnp
from jax import lax
from jax.experimental import pallas as pl
from jax.experimental.pallas import tpu as pltpu


def _attn_general_kernel(q_ref, enc_ref, out_ref, *, seq_len, tile_l):
    """Grid: (num_l_tiles,) over L ('arbitrary' — softmax reduction axis).

    q_ref:   (B, H)              projected query, loaded once (constant index)
    enc_ref: (tile_l, B, H)      one L-tile of encoder_outputs (auto-pipelined)
    out_ref: (num_l, tile_l, B)  raw scores accumulated across steps; the final
                                 step overwrites the block with softmax probs.
    """
    li = pl.program_id(0)
    num_l = pl.num_programs(0)

    enc_t = enc_ref[...].astype(jnp.float32)           # (tile_l, B, H)
    q = q_ref[...].astype(jnp.float32)                 # (B, H)

    # scores[l, b] = sum_h enc[l, b, h] * q[b, h]
    # VPU multiply + cross-lane (XLU) reduction over H; a batched mat-vec gets
    # almost no MXU utilization, so the vector path is the right one here.
    s_lb = jnp.sum(enc_t * q[None, :, :], axis=-1)     # (tile_l, B)

    # Mask rows past the true sequence length (partial last tile / padding).
    row = li * tile_l + lax.broadcasted_iota(jnp.int32, s_lb.shape, 0)
    s_lb = jnp.where(row < seq_len, s_lb, -jnp.inf)

    out_ref[li] = s_lb

    # Finalize: softmax over L on the VMEM-resident scores block.
    @pl.when(li == num_l - 1)
    def _finalize():
        s = out_ref[...]                               # (num_l, tile_l, B)
        m = jnp.max(jnp.max(s, axis=1, keepdims=True), axis=0, keepdims=True)
        e = jnp.exp(s - m)                             # masked rows -> 0
        d = jnp.sum(jnp.sum(e, axis=1, keepdims=True), axis=0, keepdims=True)
        out_ref[...] = e * pl.reciprocal(d, approx=True)


def _choose_tile_l(seq_len, batch, hidden, itemsize):
    # Target ~8 MiB per encoder tile so the double-buffered stream stays well
    # inside the 32 MiB scoped-VMEM budget requested below (v7x-safe).
    budget_bytes = 8 * 1024 * 1024
    row_bytes = max(1, batch * hidden * itemsize)
    t = budget_bytes // row_bytes
    if t >= seq_len:
        return int(seq_len)
    return int(min(seq_len, max(8, (t // 8) * 8)))


def attn_forward_general(hidden, encoder_outputs, w, bias=None):
    """hidden: (1, B, H), encoder_outputs: (L, B, H), w: (H, H) -> (B, 1, L)."""
    del bias  # hidden·bias is a per-row constant -> cancelled by the softmax.
    L, B, H = encoder_outputs.shape

    # Tiny query projection (exact f32); replaces the L× larger projection of
    # every encoder position in the original formulation.
    q = jnp.dot(hidden[0].astype(jnp.float32), w.astype(jnp.float32),
                precision=lax.Precision.HIGHEST)        # (B, H)

    itemsize = encoder_outputs.dtype.itemsize
    tile_l = _choose_tile_l(L, B, H, itemsize)
    num_l = pl.cdiv(L, tile_l)
    l_pad = num_l * tile_l

    enc_block_bytes = tile_l * B * H * itemsize
    est_vmem = 2 * enc_block_bytes + 2 * l_pad * B * 4 + 2 * B * H * 4 + (2 << 20)
    vmem_limit = int(min(64 * 1024 * 1024, max(32 * 1024 * 1024, est_vmem)))

    kernel = functools.partial(_attn_general_kernel, seq_len=L, tile_l=tile_l)

    # Note: B is kept inside the block (slicing the middle dim of (L,B,H)
    # would create sub-(8,128) blocks); the single L axis must be 'arbitrary'
    # because the in-kernel softmax makes it a reduction axis.
    scores = pl.pallas_call(
        kernel,
        out_shape=jax.ShapeDtypeStruct((num_l, tile_l, B), jnp.float32),
        grid=(num_l,),
        in_specs=[
            pl.BlockSpec((B, H), lambda l: (0, 0)),             # q  (resident)
            pl.BlockSpec((tile_l, B, H), lambda l: (l, 0, 0)),  # enc (streamed)
        ],
        out_specs=pl.BlockSpec((num_l, tile_l, B), lambda l: (0, 0, 0)),
        compiler_params=pltpu.CompilerParams(
            dimension_semantics=("arbitrary",),
            vmem_limit_bytes=vmem_limit),
        cost_estimate=pl.CostEstimate(
            flops=2 * B * L * H + 6 * B * l_pad,
            transcendentals=B * l_pad,
            bytes_accessed=(encoder_outputs.size * itemsize
                            + B * H * 4 + l_pad * B * 4)),
    )(q, encoder_outputs)

    # Layout plumbing on the tiny (~B*L) scores array only.
    probs = scores.reshape(l_pad, B)[:L]                 # (L, B), drop padding
    return jnp.transpose(probs, (1, 0))[:, None, :]      # (B, 1, L)


def reference_forward_general(hidden, encoder_outputs, w, bias):
    """Plain-JAX mirror of the PyTorch module (method='general')."""
    energy = jnp.einsum("lbh,oh->lbo", encoder_outputs, w,
                        precision=lax.Precision.HIGHEST) + bias   # (L, B, H)
    scores = jnp.einsum("bo,lbo->bl", hidden[0], energy,
                        precision=lax.Precision.HIGHEST)          # (B, L)
    return jax.nn.softmax(scores, axis=-1)[:, None, :]            # (B, 1, L)


if __name__ == "__main__":
    B, L, H = 2, 8, 32

    key = jax.random.PRNGKey(0)
    k1, k2, k3, k4 = jax.random.split(key, 4)

    # Parameters shaped like nn.Linear(H, H): weight (out, in), bias (out,).
    w = jax.random.normal(k1, (H, H), jnp.float32) * (1.0 / jnp.sqrt(H))
    bias = jax.random.normal(k2, (H,), jnp.float32) * 0.01

    hidden = jax.random.normal(k3, (1, B, H), jnp.float32)
    encoder_outputs = jax.random.normal(k4, (L, B, H), jnp.float32)

    attn_fn = jax.jit(attn_forward_general)
    out = jax.block_until_ready(attn_fn(hidden, encoder_outputs, w, bias))

    ref = reference_forward_general(hidden, encoder_outputs, w, bias)
    assert out.shape == (B, 1, L), out.shape
    # approx=True reciprocal in the kernel -> slightly relaxed tolerance.
    assert jnp.allclose(out, ref, atol=2e-3, rtol=2e-3), (
        "mismatch vs reference, max abs err = "
        + str(float(jnp.max(jnp.abs(out - ref)))))

    print("KERNEL_OK")
</pallas_src>

<mosaic_0001>
module attributes {stable_mosaic.version = 11 : i64} {
  func.func @_attn_general_kernel(%arg0: i32, %arg1: memref<2x32xf32, #tpu.memory_space<vmem>>, %arg2: memref<8x2x32xf32, #tpu.memory_space<vmem>>, %arg3: memref<1x8x2xf32, #tpu.memory_space<vmem>>) attributes {dimension_semantics = [#tpu.dimension_semantics<arbitrary>], iteration_bounds = array<i64: 1>, scalar_prefetch = 0 : i64, scratch_operands = 0 : i64, tpu.core_type = #tpu.core_type<tc>, window_params = [{pipeline_mode = #tpu.pipeline_mode<synchronous>, transform_indices = @transform_0, window_bounds = array<i64: 2, 32>}, {transform_indices = @transform_1, window_bounds = array<i64: 8, 2, 32>}, {pipeline_mode = #tpu.pipeline_mode<synchronous>, transform_indices = @transform_2, window_bounds = array<i64: 1, 8, 2>}]} {
    %c0 = arith.constant 0 : index
    %c0_0 = arith.constant 0 : index
    %c0_1 = arith.constant 0 : index
    %0 = vector.load %arg2[%c0, %c0_0, %c0_1] : memref<8x2x32xf32, #tpu.memory_space<vmem>>, vector<8x2x32xf32>
    %c0_2 = arith.constant 0 : index
    %c0_3 = arith.constant 0 : index
    %1 = vector.load %arg1[%c0_2, %c0_3] : memref<2x32xf32, #tpu.memory_space<vmem>>, vector<2x32xf32>
    %2 = vector.shape_cast %1 : vector<2x32xf32> to vector<1x2x32xf32>
    %3 = vector.broadcast %2 : vector<1x2x32xf32> to vector<8x2x32xf32>
    %4 = arith.mulf %0, %3 : vector<8x2x32xf32>
    %cst = arith.constant dense<0.000000e+00> : vector<8x2xf32>
    %5 = vector.multi_reduction <add>, %4, %cst [2] : vector<8x2x32xf32> to vector<8x2xf32>
    %c8_i32 = arith.constant 8 : i32
    %6 = arith.muli %arg0, %c8_i32 : i32
    %7 = tpu.iota {dimensions = array<i32: 0>} : vector<8x2xi32>
    %8 = vector.broadcast %6 : i32 to vector<8x2xi32>
    %9 = arith.addi %8, %7 : vector<8x2xi32>
    %c8_i32_4 = arith.constant 8 : i32
    %10 = vector.broadcast %c8_i32_4 : i32 to vector<8x2xi32>
    %11 = arith.cmpi slt, %9, %10 : vector<8x2xi32>
    %cst_5 = arith.constant 0xFF800000 : f32
    %12 = vector.broadcast %cst_5 : f32 to vector<8x2xf32>
    %13 = arith.select %11, %5, %12 : vector<8x2xi1>, vector<8x2xf32>
    %14 = arith.index_cast %arg0 : i32 to index
    %c0_6 = arith.constant 0 : index
    %c0_7 = arith.constant 0 : index
    %15 = vector.load %arg3[%14, %c0_6, %c0_7] : memref<1x8x2xf32, #tpu.memory_space<vmem>>, vector<1x8x2xf32>
    %16 = vector.shape_cast %15 : vector<1x8x2xf32> to vector<8x2xf32>
    %17 = vector.shape_cast %13 : vector<8x2xf32> to vector<1x8x2xf32>
    tpu.vector_store %arg3[%14, %c0_6, %c0_7], %17 {strides = array<i32>} : memref<1x8x2xf32, #tpu.memory_space<vmem>>, vector<1x8x2xf32>,
    %c0_i32 = arith.constant 0 : i32
    %18 = arith.cmpi eq, %arg0, %c0_i32 : i32
    %19 = arith.extui %18 : i1 to i32
    %c0_i32_8 = arith.constant 0 : i32
    %20 = arith.cmpi ne, %19, %c0_i32_8 : i32
    scf.if %20 {
      %c0_9 = arith.constant 0 : index
      %c0_10 = arith.constant 0 : index
      %c0_11 = arith.constant 0 : index
      %21 = vector.load %arg3[%c0_9, %c0_10, %c0_11] : memref<1x8x2xf32, #tpu.memory_space<vmem>>, vector<1x8x2xf32>
      %cst_12 = arith.constant dense<0xFF800000> : vector<1x2xf32>
      %22 = vector.multi_reduction <maximumf>, %21, %cst_12 [1] : vector<1x8x2xf32> to vector<1x2xf32>
      %23 = vector.shape_cast %22 : vector<1x2xf32> to vector<1x1x2xf32>
      %cst_13 = arith.constant dense<0xFF800000> : vector<1x2xf32>
      %24 = vector.multi_reduction <maximumf>, %23, %cst_13 [0] : vector<1x1x2xf32> to vector<1x2xf32>
      %25 = vector.shape_cast %24 : vector<1x2xf32> to vector<1x1x2xf32>
      %26 = vector.broadcast %25 : vector<1x1x2xf32> to vector<1x8x2xf32>
      %27 = arith.subf %21, %26 : vector<1x8x2xf32>
      %28 = math.exp %27 : vector<1x8x2xf32>
      %cst_14 = arith.constant dense<0.000000e+00> : vector<1x2xf32>
      %29 = vector.multi_reduction <add>, %28, %cst_14 [1] : vector<1x8x2xf32> to vector<1x2xf32>
      %30 = vector.shape_cast %29 : vector<1x2xf32> to vector<1x1x2xf32>
      %cst_15 = arith.constant dense<0.000000e+00> : vector<1x2xf32>
      %31 = vector.multi_reduction <add>, %30, %cst_15 [0] : vector<1x1x2xf32> to vector<1x2xf32>
      %32 = vector.shape_cast %31 : vector<1x2xf32> to vector<1x1x2xf32>
      %33 = tpu.reciprocal %32 {approx = true} : vector<1x1x2xf32> -> vector<1x1x2xf32>
      %34 = vector.broadcast %33 : vector<1x1x2xf32> to vector<1x8x2xf32>
      %35 = arith.mulf %28, %34 : vector<1x8x2xf32>
      %c0_16 = arith.constant 0 : index
      %c0_17 = arith.constant 0 : index
      %c0_18 = arith.constant 0 : index
      %36 = vector.load %arg3[%c0_16, %c0_17, %c0_18] : memref<1x8x2xf32, #tpu.memory_space<vmem>>, vector<1x8x2xf32>
      tpu.vector_store %arg3[%c0_16, %c0_17, %c0_18], %35 {strides = array<i32>} : memref<1x8x2xf32, #tpu.memory_space<vmem>>, vector<1x8x2xf32>,
    } else {
    }
    return
  }
  func.func @transform_0(%arg0: i32) -> (i32, i32) {
    %c0_i32 = arith.constant 0 : i32
    %c0_i32_0 = arith.constant 0 : i32
    %c0_i32_1 = arith.constant 0 : i32
    return %c0_i32, %c0_i32_0 : i32, i32
  }
  func.func @transform_1(%arg0: i32) -> (i32, i32, i32) {
    %c0_i32 = arith.constant 0 : i32
    %c0_i32_0 = arith.constant 0 : i32
    %c0_i32_1 = arith.constant 0 : i32
    return %arg0, %c0_i32, %c0_i32_0 : i32, i32, i32
  }
  func.func @transform_2(%arg0: i32) -> (i32, i32, i32) {
    %c0_i32 = arith.constant 0 : i32
    %c0_i32_0 = arith.constant 0 : i32
    %c0_i32_1 = arith.constant 0 : i32
    %c0_i32_2 = arith.constant 0 : i32
    return %c0_i32, %c0_i32_0, %c0_i32_1 : i32, i32, i32
  }
}

</mosaic_0001>

<bundles_post_ra>
// kernel: attn_forward_general.1
= control target key start
LH: loop header
LB: loop body
LE: loop exit
PB: predicated region body
PF: predicated region fallthrough
CT: control target
= control target key end

     0   :  { %vm28_vm0 = vcmask 254976   ;;  %v67_v25 = vlaneseq  ;;  %vm101_vm1 = vcmask 1041409   ;;  %vm103_vm2 = vcmask 1042434   ;;  %s217_s0 = inlined_call_operand.vmem [shape: f32[2,32], index: 0, kind: input, shape index: {}]   ;;  %s218_s1 = inlined_call_operand.vmem [shape: f32[8,2,32], index: 1, kind: input, shape index: {}]   ;;  %s219_s2 = inlined_call_operand.vmem [shape: f32[1,8,2], index: 2, kind: output, shape index: {}]  }
   0x1   :  { %v11_v0 = vld [vmem:[%s218_s1] sm:$0x3]  ;;  %v13_v2 = vld [vmem:[%s218_s1 + $0x4] sm:$0x3]  ;;  %v12_v5 = vld [vmem:[%s218_s1 + $0x2] sm:$0x3] }
   0x2   :  { %v19_v1 = vld [vmem:[%s217_s0] sm:$0x3]  ;;  %v14_v6 = vld [vmem:[%s218_s1 + $0x6] sm:$0x3]  ;;  %v15_v9 = vld [vmem:[%s218_s1 + $0x8] sm:$0x3] }
   0x3   :  { %v20_v3 = vmul.f32 %v19_v1, %v11_v0  ;;  %v22_v4 = vmul.f32 %v19_v1, %v13_v2  ;;  %v21_v7 = vmul.f32 %v19_v1, %v12_v5  ;;  %v23_v8 = vmul.f32 %v19_v1, %v14_v6  ;;  %v16_v10 = vld [vmem:[%s218_s1 + $0xa] sm:$0x3]  ;;  %v17_v17 = vld [vmem:[%s218_s1 + $0xc] sm:$0x3]  ;;  %v18_v18 = vld [vmem:[%s218_s1 + $0xe] sm:$0x3] }
   0x4   :  { %v24_v15 = vmul.f32 %v19_v1, %v15_v9  ;;  %v25_v16 = vmul.f32 %v19_v1, %v16_v10  ;;  %v26_v21 = vmul.f32 %v19_v1, %v17_v17  ;;  %v27_v22 = vmul.f32 %v19_v1, %v18_v18 }
   0x5   :  { %v29_v11 = vsel %vm28_vm0, %v20_v3, 0.0  ;;  %v35_v12 = vsel %vm28_vm0, %v22_v4, 0.0  ;;  %v32_v13 = vsel %vm28_vm0, %v21_v7, 0.0  ;;  %v38_v14 = vsel %vm28_vm0, %v23_v8, 0.0 }
   0x6   :  { %30 = vadd.xlane.f32.xlu0 %v29_v11  ;;  %36 = vadd.xlane.f32.xlu1 %v35_v12  ;;  %v41_v19 = vsel %vm28_vm0, %v24_v15, 0.0  ;;  %v44_v20 = vsel %vm28_vm0, %v25_v16, 0.0  ;;  %v47_v23 = vsel %vm28_vm0, %v26_v21, 0.0  ;;  %v50_v24 = vsel %vm28_vm0, %v27_v22, 0.0 }
   0x7   :  { %v68_v26 = vand.u32 127, %v67_v25  ;;  %v70_v27 = vshrl.u32 %v67_v25, 7  ;;  %vm105_vm3 = vcmask 1043459   ;;  %vm107_vm4 = vcmask 1044484  }
   0x8   :  { %vm109_vm5 = vcmask 1045509   ;;  %vm111_vm6 = vcmask 1046534   ;;  %vm113_vm7 = vcmask 1047559   ;;  %vm118_vm8 = vcmask 15360  }
   0x9   :  { %v71_v30 = vsub.s32 %v68_v26, %v70_v27 }
   0xa   :  { %33 = vadd.xlane.f32.xlu0 %v32_v13  ;;  %39 = vadd.xlane.f32.xlu1 %v38_v14 }
   0xe   :  { %42 = vadd.xlane.f32.xlu0 %v41_v19  ;;  %45 = vadd.xlane.f32.xlu1 %v44_v20 }
  0x12   :  { %48 = vadd.xlane.f32.xlu0 %v47_v23  ;;  %51 = vadd.xlane.f32.xlu1 %v50_v24 }
  0x93   :  { %v31_v28 = vpop.xlane.xlu0 %30  ;;  %v37_v29 = vpop.xlane.xlu1 %36 }
  0x94   :  { %v72_v33 = vrot.slane %v31_v28, %v71_v30  ;;  %v80_v36 = vrot.slane %v37_v29, %v71_v30 }
  0x97   :  { %v34_v31 = vpop.xlane.xlu0 %33  ;;  %v40_v32 = vpop.xlane.xlu1 %39 }
  0x98   :  { %v76_v34 = vrot.slane %v34_v31, %v71_v30  ;;  %v84_v35 = vrot.slane %v40_v32, %v71_v30 }
  0x9a   :  { %v102_v37 = vsel %vm101_vm1, %v76_v34, %v72_v33 }
  0x9b   :  { %v104_v38 = vsel %vm103_vm2, %v80_v36, %v102_v37  ;;  %v43_v39 = vpop.xlane.xlu0 %42  ;;  %v46_v40 = vpop.xlane.xlu1 %45 }
  0x9c   :  { %v106_v41 = vsel %vm105_vm3, %v84_v35, %v104_v38  ;;  %v88_v42 = vrot.slane %v43_v39, %v71_v30  ;;  %v92_v43 = vrot.slane %v46_v40, %v71_v30 }
  0x9e   :  { %v108_v44 = vsel %vm107_vm4, %v88_v42, %v106_v41 }
  0x9f   :  { %v49_v45 = vpop.xlane.xlu0 %48  ;;  %v52_v46 = vpop.xlane.xlu1 %51  ;;  %v110_v49 = vsel %vm109_vm5, %v92_v43, %v108_v44 }
  0xa0   :  { %v96_v47 = vrot.slane %v49_v45, %v71_v30  ;;  %v100_v48 = vrot.slane %v52_v46, %v71_v30 }
  0xa2   :  { %v112_v50 = vsel %vm111_vm6, %v96_v47, %v110_v49 }
  0xa3   :  { %v114_v51 = vsel %vm113_vm7, %v100_v48, %v112_v50 }
  0xa4   :  { %119 = vst.msk [vmem:[%s219_s2] sm:$0xff] %vm118_vm8, %v114_v51 }
  0xab   :  { %v124_v52 = vld [vmem:[%s219_s2] sm:$0xff] }
  0xac   :  { %v125_v53 = vsel %vm118_vm8, %v124_v52, -inf }
  0xad   :  { %v126_v54 = vrot.slane %v125_v53, 4 }
  0xaf   :  { %v127_v55 = vmax.f32 %v125_v53, %v126_v54 }
  0xb1   :  { %v128_v56 = vrot.slane %v127_v55, 2 }
  0xb3   :  { %v129_v57 = vmax.f32 %v127_v55, %v128_v56 }
  0xb5   :  { %v130_v58 = vrot.slane %v129_v57, 1 }
  0xb7   :  { %v131_v59 = vmax.f32 %v129_v57, %v130_v58 }
  0xb9   :  { %v132_v60 = vsub.f32 %v124_v52, %v131_v59 }
  0xbb   :  { %v133_v61 = vmul.f32 1.442695, %v132_v60 }
  0xbd   :  { %150 = vpow2.f32 %v133_v61 }
  0xc7   :  { %v151_v62 = vpop.eup %150 }
  0xc8   :  { %v135_v63 = vsel %vm118_vm8, %v151_v62, 0.0 }
  0xc9   :  { %v136_v0 = vrot.slane %v135_v63, 4 }
  0xcb   :  { %v137_v1 = vadd.f32 %v136_v0, %v135_v63 }
  0xcd   :  { %v138_v2 = vrot.slane %v137_v1, 2 }
  0xcf   :  { %v139_v3 = vadd.f32 %v138_v2, %v137_v1 }
  0xd1   :  { %v140_v4 = vrot.slane %v139_v3, 1 }
  0xd3   :  { %v141_v5 = vadd.f32 %v140_v4, %v139_v3 }
  0xd5   :  { %152 = vrcp.f32 %v141_v5 }
  0xdf   :  { %v153_v6 = vpop.eup %152 }
  0xe0   :  { %v144_v7 = vmul.f32 %v153_v6, %v151_v62 }
  0xe2   :  { %145 = vst.msk [vmem:[%s219_s2] sm:$0xff] %vm118_vm8, %v144_v7 }

</bundles_post_ra>
